<compile_context>
chip_gen: v6e
topology: v6e:2x2x1
jax: 0.10.0
libtpu: 0.0.40
codegen_flags: <defaults>
</compile_context>

<pallas_src>
import jax
import jax.numpy as jnp
from jax.experimental import pallas as pl
from jax.experimental.pallas import tpu as pltpu


def _cut_kernel(x_ref, w_ref, shift_ref, o_ref):
    # x_ref:     (1, 2, 2C, tp)  -- axis 1 = input-row parity dh; the 2C axis
    #                               is ordered (dw, c); lanes = tp pixels.
    # w_ref:     (2, Cout, 2C)   -- BN-scaled 1x1-conv weights per dh.
    # shift_ref: (Cout, 1)       -- folded conv-bias + BN shift.
    # o_ref:     (1, Cout, tp)   -- channel-major output tile (NCHW order).
    y = jnp.dot(w_ref[0], x_ref[0, 0], preferred_element_type=jnp.float32)
    y = y + jnp.dot(w_ref[1], x_ref[0, 1], preferred_element_type=jnp.float32)
    y = y + shift_ref[...]                       # broadcast over pixel lanes
    o_ref[0] = y.astype(o_ref.dtype)


def _round_up(v, m):
    return (v + m - 1) // m * m


def _sublane(itemsize):
    return {4: 8, 2: 16, 1: 32}.get(itemsize, 8)


def _choose_tile_pixels(P, batch, c2, cout, in_itemsize, out_itemsize,
                        target_step_bytes=4 << 20, min_grid_steps=8,
                        min_tile_pixels=512):
    """Largest lane-aligned divisor of P whose *padded* VMEM footprint fits
    the per-step budget; shrink (not below min_tile_pixels) only if that buys
    a grid long enough to pipeline / feed both v7x TensorCores."""
    sub_in, sub_out = _sublane(in_itemsize), _sublane(out_itemsize)

    def step_bytes(tp):          # true sublane/lane padded footprint per step
        lanes = _round_up(tp, 128)
        in_b = 2 * _round_up(c2, sub_in) * lanes * in_itemsize    # (1,2,2C,tp)
        out_b = _round_up(cout, sub_out) * lanes * out_itemsize   # (1,Cout,tp)
        return in_b + out_b

    # Lane-dense candidates: divisors of P that are multiples of 128, plus P
    # itself (a full-extent block is always a legal shape).
    cands = sorted({d for d in range(128, P + 1, 128) if P % d == 0} | {P})
    fitting = [d for d in cands if step_bytes(d) <= target_step_bytes]
    if not fitting:
        fitting = [cands[0]]
    tp = fitting[-1]                              # largest fitting candidate
    for d in reversed(fitting):                   # grow the grid if cheap
        if d < min_tile_pixels:
            break
        if batch * (P // d) >= min_grid_steps:
            tp = d
            break
    return tp
    # TODO(synk): support ragged pixel tiles (pl.cdiv grid + masked tail) for
    # shapes whose only lane-aligned divisor is the full extent and too large.


def cut_forward(x, conv_w, conv_b, gamma, beta, running_mean, running_var,
                eps=1e-5):
    """Forward pass of `Cut` for NCHW input x of shape (B, C, H, W)."""
    B, C, H, W = x.shape
    assert H % 2 == 0 and W % 2 == 0, "Cut requires even spatial dims"
    Ho, Wo = H // 2, W // 2
    P = Ho * Wo
    Cout = conv_w.shape[0]
    C2 = 2 * C
    act_dtype = x.dtype
    in_isz = jnp.dtype(act_dtype).itemsize
    out_isz = in_isz

    # --- single HBM relayout pass: (B,C,H,W) -> (B, dh, (dw,c), ho*wo) ------
    #   xt[b, dh, dw*C + c, ho*Wo + wo] == x[b, c, 2*ho + dh, 2*wo + dw]
    xt = x.reshape(B, C, Ho, 2, Wo, 2)
    xt = jnp.transpose(xt, (0, 3, 5, 1, 2, 4)).reshape(B, 2, C2, P)
    # TODO(synk): a fully fused small-C fast path could read NCHW directly in
    # the kernel (on-chip lane de-interleave) and drop this pass as well.

    # --- fold eval-mode BatchNorm into the 1x1-conv weights -----------------
    # TODO(synk): training-mode BatchNorm (batch statistics) not implemented.
    wflat = conv_w.reshape(Cout, 4 * C).astype(jnp.float32)
    scale = gamma / jnp.sqrt(running_var + eps)                   # (Cout,)
    shift = (conv_b - running_mean) * scale + beta                # (Cout,)
    # torch concat order [x0|x1|x2|x3]: x0=(dh0,dw0) x1=(dh1,dw0)
    # x2=(dh0,dw1) x3=(dh1,dw1)  ->  per-dh matrices with (dw, c) columns.
    w_dh0 = jnp.concatenate([wflat[:, 0:C], wflat[:, 2 * C:3 * C]], axis=1)
    w_dh1 = jnp.concatenate([wflat[:, C:2 * C], wflat[:, 3 * C:4 * C]], axis=1)
    wt = (jnp.stack([w_dh0, w_dh1], axis=0)
          * scale[None, :, None]).astype(act_dtype)               # (2,Cout,2C)
    shift2d = shift.reshape(Cout, 1).astype(jnp.float32)

    # --- tiling (padded-VMEM aware, lane-dense) ------------------------------
    tp = _choose_tile_pixels(P, B, C2, Cout, in_isz, out_isz)
    grid = (B, P // tp)

    flops = 2 * B * P * (4 * C) * Cout
    bytes_accessed = (B * P * 4 * C * in_isz         # activations
                      + B * P * Cout * out_isz       # output
                      + 2 * C2 * Cout * in_isz       # weights
                      + 4 * Cout)                    # shift

    # TODO(synk): for production Cout >= 128 add an N grid axis over Cout
    # (tn=256 on v6e/v7x, 128 on v5e) so MXU tiles stay aligned.
    out = pl.pallas_call(
        _cut_kernel,
        out_shape=jax.ShapeDtypeStruct((B, Cout, P), act_dtype),
        grid=grid,
        in_specs=[
            pl.BlockSpec((1, 2, C2, tp), lambda b, j: (b, 0, 0, j)),
            pl.BlockSpec((2, Cout, C2), lambda b, j: (0, 0, 0)),
            pl.BlockSpec((Cout, 1), lambda b, j: (0, 0)),
        ],
        out_specs=pl.BlockSpec((1, Cout, tp), lambda b, j: (b, 0, j)),
        compiler_params=pltpu.CompilerParams(
            dimension_semantics=("parallel", "parallel"),
            vmem_limit_bytes=32 * 1024 * 1024),
        cost_estimate=pl.CostEstimate(flops=flops, transcendentals=0,
                                      bytes_accessed=bytes_accessed),
    )(xt, wt, shift2d)

    # (B, Cout, Ho*Wo) -> (B, Cout, Ho, Wo): free reshape, already NCHW.
    return out.reshape(B, Cout, Ho, Wo)


def _reference(x, conv_w, conv_b, gamma, beta, running_mean, running_var,
               eps=1e-5):
    """Pure-JAX reference replicating the PyTorch forward (eval-mode BN)."""
    x0 = x[:, :, 0::2, 0::2]
    x1 = x[:, :, 1::2, 0::2]
    x2 = x[:, :, 0::2, 1::2]
    x3 = x[:, :, 1::2, 1::2]
    xc = jnp.concatenate([x0, x1, x2, x3], axis=1)          # (B, 4C, Ho, Wo)
    y = jnp.einsum("bchw,oc->bohw", xc, conv_w.reshape(conv_w.shape[0], -1))
    y = y + conv_b[None, :, None, None]
    y = (y - running_mean[None, :, None, None]) / jnp.sqrt(
        running_var[None, :, None, None] + eps)
    y = y * gamma[None, :, None, None] + beta[None, :, None, None]
    return y


if __name__ == "__main__":
    key = jax.random.PRNGKey(0)
    B, Cin, H, W = 2, 4, 16, 16
    Cout = 8

    k_x, k_w, k_b, k_g, k_bt, k_m, k_v = jax.random.split(key, 7)
    x = jax.random.normal(k_x, (B, Cin, H, W), dtype=jnp.float32)

    conv_w = jax.random.normal(k_w, (Cout, 4 * Cin, 1, 1), jnp.float32) * 0.1
    conv_b = jax.random.normal(k_b, (Cout,), jnp.float32) * 0.05
    gamma = 1.0 + 0.1 * jax.random.normal(k_g, (Cout,), jnp.float32)
    beta = 0.1 * jax.random.normal(k_bt, (Cout,), jnp.float32)
    running_mean = 0.1 * jax.random.normal(k_m, (Cout,), jnp.float32)
    running_var = 1.0 + 0.1 * jax.random.uniform(k_v, (Cout,), jnp.float32)

    fwd = jax.jit(cut_forward)
    out = jax.block_until_ready(
        fwd(x, conv_w, conv_b, gamma, beta, running_mean, running_var))

    ref = _reference(x, conv_w, conv_b, gamma, beta, running_mean,
                     running_var)
    assert out.shape == (B, Cout, H // 2, W // 2)
    # Tolerance accommodates possible reduced-precision MXU passes for f32
    # matmuls; genuine permutation/BN-folding bugs produce errors >> 1e-2.
    assert jnp.allclose(out, ref, atol=5e-3, rtol=5e-3), float(
        jnp.max(jnp.abs(out - ref)))

    print("KERNEL_OK")
</pallas_src>

<mosaic_0001>
module attributes {stable_mosaic.version = 11 : i64} {
  func.func @_cut_kernel(%arg0: i32, %arg1: i32, %arg2: memref<1x2x8x64xf32, #tpu.memory_space<vmem>>, %arg3: memref<2x8x8xf32, #tpu.memory_space<vmem>>, %arg4: memref<8x1xf32, #tpu.memory_space<vmem>>, %arg5: memref<1x8x64xf32, #tpu.memory_space<vmem>>) attributes {dimension_semantics = [#tpu.dimension_semantics<parallel>, #tpu.dimension_semantics<parallel>], iteration_bounds = array<i64: 2, 1>, scalar_prefetch = 0 : i64, scratch_operands = 0 : i64, tpu.core_type = #tpu.core_type<tc>, window_params = [{transform_indices = @transform_0, window_bounds = array<i64: 1, 2, 8, 64>}, {pipeline_mode = #tpu.pipeline_mode<synchronous>, transform_indices = @transform_1, window_bounds = array<i64: 2, 8, 8>}, {pipeline_mode = #tpu.pipeline_mode<synchronous>, transform_indices = @transform_2, window_bounds = array<i64: 8, 1>}, {transform_indices = @transform_3, window_bounds = array<i64: 1, 8, 64>}]} {
    %c0 = arith.constant 0 : index
    %c0_0 = arith.constant 0 : index
    %c0_1 = arith.constant 0 : index
    %0 = vector.load %arg3[%c0, %c0_0, %c0_1] : memref<2x8x8xf32, #tpu.memory_space<vmem>>, vector<1x8x8xf32>
    %1 = vector.shape_cast %0 : vector<1x8x8xf32> to vector<8x8xf32>
    %c0_2 = arith.constant 0 : index
    %c0_3 = arith.constant 0 : index
    %c0_4 = arith.constant 0 : index
    %c0_5 = arith.constant 0 : index
    %2 = vector.load %arg2[%c0_2, %c0_3, %c0_4, %c0_5] : memref<1x2x8x64xf32, #tpu.memory_space<vmem>>, vector<1x1x8x64xf32>
    %3 = vector.shape_cast %2 : vector<1x1x8x64xf32> to vector<8x64xf32>
    %cst = arith.constant dense<0.000000e+00> : vector<8x64xf32>
    %4 = tpu.matmul %1, %3, %cst {dimension_numbers = #tpu.dot_dimension_numbers<[1], [0], [0], [1], [0, 0, 1, 1], [], []>} : vector<8x8xf32>, vector<8x64xf32>, vector<8x64xf32> -> vector<8x64xf32>
    %c1 = arith.constant 1 : index
    %c0_6 = arith.constant 0 : index
    %c0_7 = arith.constant 0 : index
    %5 = vector.load %arg3[%c1, %c0_6, %c0_7] : memref<2x8x8xf32, #tpu.memory_space<vmem>>, vector<1x8x8xf32>
    %6 = vector.shape_cast %5 : vector<1x8x8xf32> to vector<8x8xf32>
    %c0_8 = arith.constant 0 : index
    %c1_9 = arith.constant 1 : index
    %c0_10 = arith.constant 0 : index
    %c0_11 = arith.constant 0 : index
    %7 = vector.load %arg2[%c0_8, %c1_9, %c0_10, %c0_11] : memref<1x2x8x64xf32, #tpu.memory_space<vmem>>, vector<1x1x8x64xf32>
    %8 = vector.shape_cast %7 : vector<1x1x8x64xf32> to vector<8x64xf32>
    %cst_12 = arith.constant dense<0.000000e+00> : vector<8x64xf32>
    %9 = tpu.matmul %6, %8, %cst_12 {dimension_numbers = #tpu.dot_dimension_numbers<[1], [0], [0], [1], [0, 0, 1, 1], [], []>} : vector<8x8xf32>, vector<8x64xf32>, vector<8x64xf32> -> vector<8x64xf32>
    %10 = arith.addf %4, %9 : vector<8x64xf32>
    %c0_13 = arith.constant 0 : index
    %c0_14 = arith.constant 0 : index
    %11 = vector.load %arg4[%c0_13, %c0_14] : memref<8x1xf32, #tpu.memory_space<vmem>>, vector<8x1xf32>
    %12 = vector.broadcast %11 : vector<8x1xf32> to vector<8x64xf32>
    %13 = arith.addf %10, %12 : vector<8x64xf32>
    %c0_15 = arith.constant 0 : index
    %c0_16 = arith.constant 0 : index
    %c0_17 = arith.constant 0 : index
    %14 = vector.load %arg5[%c0_15, %c0_16, %c0_17] : memref<1x8x64xf32, #tpu.memory_space<vmem>>, vector<1x8x64xf32>
    %15 = vector.shape_cast %14 : vector<1x8x64xf32> to vector<8x64xf32>
    %16 = vector.shape_cast %13 : vector<8x64xf32> to vector<1x8x64xf32>
    tpu.vector_store %arg5[%c0_15, %c0_16, %c0_17], %16 {strides = array<i32>} : memref<1x8x64xf32, #tpu.memory_space<vmem>>, vector<1x8x64xf32>,
    return
  }
  func.func @transform_0(%arg0: i32, %arg1: i32) -> (i32, i32, i32, i32) {
    %c0_i32 = arith.constant 0 : i32
    %c0_i32_0 = arith.constant 0 : i32
    %c0_i32_1 = arith.constant 0 : i32
    return %arg0, %c0_i32, %c0_i32_0, %arg1 : i32, i32, i32, i32
  }
  func.func @transform_1(%arg0: i32, %arg1: i32) -> (i32, i32, i32) {
    %c0_i32 = arith.constant 0 : i32
    %c0_i32_0 = arith.constant 0 : i32
    %c0_i32_1 = arith.constant 0 : i32
    %c0_i32_2 = arith.constant 0 : i32
    return %c0_i32, %c0_i32_0, %c0_i32_1 : i32, i32, i32
  }
  func.func @transform_2(%arg0: i32, %arg1: i32) -> (i32, i32) {
    %c0_i32 = arith.constant 0 : i32
    %c0_i32_0 = arith.constant 0 : i32
    %c0_i32_1 = arith.constant 0 : i32
    return %c0_i32, %c0_i32_0 : i32, i32
  }
  func.func @transform_3(%arg0: i32, %arg1: i32) -> (i32, i32, i32) {
    %c0_i32 = arith.constant 0 : i32
    %c0_i32_0 = arith.constant 0 : i32
    return %arg0, %c0_i32, %arg1 : i32, i32, i32
  }
}

</mosaic_0001>

<bundles_post_ra>
// kernel: cut_forward.1
= control target key start
LH: loop header
LB: loop body
LE: loop exit
PB: predicated region body
PF: predicated region fallthrough
CT: control target
= control target key end

     0   :  { %s543_s12 = smov 0   ;;  %s545_s13 = smov 0   ;;  %s585_s0 = inlined_call_operand.vmem [shape: f32[2,2,8,64], index: 0, kind: input, shape index: {}]   ;;  %s586_s1 = inlined_call_operand.vmem [shape: f32[2,8,8], index: 1, kind: input, shape index: {}]   ;;  %s587_s2 = inlined_call_operand.vmem [shape: f32[8,1], index: 2, kind: input, shape index: {}]   ;;  %s588_s3 = inlined_call_operand.vmem [shape: f32[2,8,64], index: 3, kind: output, shape index: {}]  }
   0x1   :  { %s547_s14 = smov 0  }
   0x2 LB: > { %s25_s15 = sadd.s32 1, %s514_s13  ;;  %p443_p0 = scmp.ge.s32.totalorder %s518_s14, 1  ;;  %s518_s14 = sphi %s547_s14, %s13_s14   ;;  %s514_s13 = sphi %s545_s13, %s590_s13   ;;  %s510_s12 = sphi %s543_s12, %s589_s12  }
   0x3   : > { %p27_p1 = scmp.ge.s32.totalorder %s25_s15, 2  ;;  %p156_p2 = scmp.lt.s32.totalorder %s518_s14, 3 }
   0x5   : > { %s592_s15 = smov (%p27_p1, %s25_s15), 0  ;;  %p157_p3 = pnand %p443_p0, %p156_p2 }
   0x6   : > { %p185_p4 = scmp.lt.s32.totalorder (!%p157_p3), %s510_s12, 1 }
   0x7   : > { %160 = sbr.rel (%p157_p3) target bundleno = 216 (0xd8), region = 32 }
   0xc   : > { %v520_v0 = vmov 0.0   ;;  %v353_v1 = vld [vmem:[%s587_s2] sm:$0xff]  ;;  %s594_s12 = smov (!%p185_p4, %s510_s12), 1  ;;  %vm521_vm0 = vmmov 0   ;;  %v522_v2 = vmov 0   ;;  %v447_v3 = vld [vmem:[%s586_s1 + $0x8] sm:$0xff] }
   0xd   : > { %458 = vmatprep.subr.mxu0 %v520_v0  ;;  %463 = vmatprep.subr.mxu1 %v520_v0  ;;  %s453_s18 = sshll.u32 %s594_s12, 4  ;;  %vm206_vm1 = vcmask 64512   ;;  %v200_v4 = vld [vmem:[%s586_s1] sm:$0xff]  ;;  %s446_s26 = sshll.u32 %s594_s12, 3  ;;  %vm360_vm2 = vcmask 523264  }
   0xe   : > { %460 = vmatprep.mubr.msk.f32.mxu0 %vm521_vm0, %v520_v0  ;;  %465 = vmatprep.mubr.msk.f32.mxu1 %vm521_vm0, %v520_v0  ;;  %s192_s21 = scalar_lea.vmem %s585_s0, %s453_s18  ;;  %s199_s29 = scalar_lea.vmem %s588_s3, %s446_s26 }
   0xf   : > { %495 = vset.pattern.permute.xlu0 %v522_v2  ;;  %v448_v5 = vld [vmem:[%s192_s21 + $0x8] sm:$0xff]  ;;  %v201_v6 = vld [vmem:[%s192_s21] sm:$0xff] }
  0x10   : > { %356 = vperm.xlu0 %495, %v353_v1   ;;  %459 = vmatpush3.msra.mxu0 %v448_v5 }
  0x11   : > { %464 = vmatpush3.msra.mxu1 %v201_v6  ;;  %461 = vmatmul.mubr.msk.f32.vlgmr.msra.gmra.mxu0 %vm206_vm1, %v447_v3 }
  0x12   : > { %466 = vmatmul.mubr.msk.f32.vlgmr.msra.gmra.mxu1 %vm206_vm1, %v200_v4 }
  0x8b   : > { %v357_v7 = vpop.permute.xlu0 %356 }
  0xd1   : > { %v276_v8 = vpop.f32.mrf.mxu0 }
  0xd2   : > { %v349_v9 = vpop.f32.mrf.mxu1 }
  0xd3   : > { %v350_v10 = vadd.f32 %v349_v9, %v276_v8  ;;  %v462_v11 = vpop.f32.mrf.mxu0 }
  0xd4   : > { %v467_v12 = vpop.f32.mrf.mxu1 }
  0xd5   : > { %v359_v13 = vadd.f32 %v357_v7, %v350_v10 }
  0xd7   : > { %361 = vst.msk [vmem:[%s199_s29] sm:$0xff] %vm360_vm2, %v359_v13 }
  0xd8 PF: > { %s13_s14 = sadd.s32 1, %s518_s14   ;;  %s589_s12 = smov %s514_s13 }
  0xd9   : > { %p10_p5 = scmp.ge.s32.totalorder %s13_s14, 4   ;;  %s590_s13 = smov %s592_s15 }
  0xdb   :  { %12 = sbr.rel (!%p10_p5) target bundleno = 2 (0x2), region = 64 }

</bundles_post_ra>
